<compile_context>
chip_gen: v7x
topology: tpu7x:2x2x1
jax: 0.10.0
libtpu: 0.0.40
codegen_flags: <defaults>
</compile_context>

<pallas_src>
import math
import jax
import jax.numpy as jnp
from jax.experimental import pallas as pl
from jax.experimental.pallas import tpu as pltpu


def graphnet_kernel(x_ref, adj_ref, w_ref, o_ref):
    # x_ref:   (Bt, N, dp)       padded node features
    # adj_ref: (Bt, N, N)        raw adjacency
    # w_ref:   (dp, 2*dp)        [W_l | W_l1], zero-padded
    # o_ref:   (Bt, N, dp)
    Bt, N, dp = x_ref.shape

    # Single wide projection: M = Bt*N rows, 2*dp output lanes.
    x2d = x_ref[...].reshape(Bt * N, dp)
    proj = jnp.dot(x2d, w_ref[...], preferred_element_type=jnp.float32)
    x1 = proj[:, :dp].reshape(Bt, N, dp)
    e1 = proj[:, dp:].reshape(Bt, N, dp)

    adj = adj_ref[...]                                       # (Bt, N, N)

    # Row-normalization fused into the matmul output:
    #   (diag(r_inv) @ adj) @ e1 == r_inv * (adj @ e1)
    rowsum = jnp.sum(adj, axis=2, keepdims=True)             # (Bt, N, 1)
    r_inv = jnp.where(rowsum == 0.0, 0.0, 1.0 / rowsum)      # inf -> 0 guard

    e11 = jnp.einsum("bnm,bme->bne", adj, e1,
                     preferred_element_type=jnp.float32)     # (Bt, N, dp)

    h = x1 + r_inv * e11
    # leaky_relu, negative_slope = 0.01
    o_ref[...] = jnp.maximum(h, 0.01 * h)


def _round_up(x, m):
    return ((x + m - 1) // m) * m


def graphnet_forward(X, adj, W_l, W_l1):
    B, N, d = X.shape
    dp = _round_up(d, 128)  # lane-dense hidden dim
    f32 = jnp.float32

    Xp = X.astype(f32)
    Wl = W_l.astype(f32)
    Wl1 = W_l1.astype(f32)
    if dp != d:
        pad = dp - d
        Xp = jnp.pad(Xp, ((0, 0), (0, 0), (0, pad)))
        Wl = jnp.pad(Wl, ((0, pad), (0, pad)))
        Wl1 = jnp.pad(Wl1, ((0, pad), (0, pad)))
    W_cat = jnp.concatenate([Wl, Wl1], axis=1)               # (dp, 2*dp)
    adj = adj.astype(f32)

    # Pick batch-chunk Bt: largest divisor of B whose (double-buffered)
    # in/out tiles fit a conservative VMEM budget; prefer >= 2 grid steps
    # so both TensorCores of a megacore / v7x chip stay busy.
    def tile_bytes(bt):
        return 4 * bt * (N * N + 2 * N * dp) * 2

    budget = 10 * 1024 * 1024
    candidates = [c for c in range(1, B + 1)
                  if B % c == 0 and tile_bytes(c) <= budget]
    if not candidates:
        candidates = [1]
    multi = [c for c in candidates if B // c >= 2]
    Bt = max(multi) if multi else max(candidates)
    grid = (B // Bt,)

    cost = pl.CostEstimate(
        flops=2 * B * N * dp * (2 * dp + N),
        transcendentals=0,
        bytes_accessed=4 * (B * N * N + 2 * B * N * dp + 2 * dp * dp),
    )

    out = pl.pallas_call(
        graphnet_kernel,
        out_shape=jax.ShapeDtypeStruct((B, N, dp), f32),
        grid_spec=pltpu.PrefetchScalarGridSpec(
            num_scalar_prefetch=0,
            grid=grid,
            in_specs=[
                pl.BlockSpec((Bt, N, dp), lambda b: (b, 0, 0)),     # X
                pl.BlockSpec((Bt, N, N), lambda b: (b, 0, 0)),      # adj
                pl.BlockSpec((dp, 2 * dp), lambda b: (0, 0)),       # [W_l|W_l1]
            ],
            out_specs=pl.BlockSpec((Bt, N, dp), lambda b: (b, 0, 0)),
        ),
        compiler_params=pltpu.CompilerParams(
            dimension_semantics=("parallel",),
            vmem_limit_bytes=32 * 1024 * 1024,
        ),
        cost_estimate=cost,
    )(Xp, adj, W_cat)

    return out[:, :, :d]


def reference_forward(X, adj, W_l, W_l1):
    rowsum = jnp.sum(adj, axis=2, keepdims=True)
    r_inv = jnp.where(rowsum == 0.0, 0.0, 1.0 / rowsum)
    adj_n = adj * r_inv
    e1 = jnp.einsum("bnd,de->bne", X, W_l1)
    e11 = jnp.einsum("bnm,bmd->bnd", adj_n, e1)
    x1 = jnp.einsum("bnd,de->bne", X, W_l)
    h = x1 + e11
    return jnp.where(h > 0, h, 0.01 * h)


if __name__ == "__main__":
    B, N, d = 2, 8, 32

    key = jax.random.PRNGKey(0)
    k_x, k_adj, k_wl, k_wl1, k_b = jax.random.split(key, 5)

    # Parameter init matching reset_parameters(): uniform(-stdv, stdv), stdv=1/sqrt(d)
    stdv = 1.0 / math.sqrt(d)
    W_l = jax.random.uniform(k_wl, (d, d), jnp.float32, -stdv, stdv)
    W_l1 = jax.random.uniform(k_wl1, (d, d), jnp.float32, -stdv, stdv)
    bias = jax.random.uniform(k_b, (d,), jnp.float32, -stdv, stdv)  # unused in forward

    X = jax.random.normal(k_x, (B, N, d), jnp.float32)
    # Random 0/1 adjacency (some rows may be all-zero -> exercises inf->0 path)
    adj = (jax.random.uniform(k_adj, (B, N, N)) > 0.5).astype(jnp.float32)

    out = graphnet_forward(X, adj, W_l, W_l1)
    out = jax.block_until_ready(out)

    ref = reference_forward(X, adj, W_l, W_l1)
    assert out.shape == (B, N, d)
    assert jnp.allclose(out, ref, atol=1e-5, rtol=1e-5), "mismatch vs reference"

    print("KERNEL_OK")
</pallas_src>

<mosaic_0001>
module attributes {stable_mosaic.version = 11 : i64} {
  func.func @graphnet_kernel(%arg0: i32, %arg1: memref<1x8x128xf32, #tpu.memory_space<vmem>>, %arg2: memref<1x8x8xf32, #tpu.memory_space<vmem>>, %arg3: memref<128x256xf32, #tpu.memory_space<vmem>>, %arg4: memref<1x8x128xf32, #tpu.memory_space<vmem>>) attributes {dimension_semantics = [#tpu.dimension_semantics<parallel>], iteration_bounds = array<i64: 2>, scalar_prefetch = 0 : i64, scratch_operands = 0 : i64, tpu.core_type = #tpu.core_type<tc>, window_params = [{transform_indices = @transform_0, window_bounds = array<i64: 1, 8, 128>}, {transform_indices = @transform_1, window_bounds = array<i64: 1, 8, 8>}, {pipeline_mode = #tpu.pipeline_mode<synchronous>, transform_indices = @transform_2, window_bounds = array<i64: 128, 256>}, {transform_indices = @transform_3, window_bounds = array<i64: 1, 8, 128>}]} {
    %c0 = arith.constant 0 : index
    %c0_0 = arith.constant 0 : index
    %c0_1 = arith.constant 0 : index
    %0 = vector.load %arg1[%c0, %c0_0, %c0_1] : memref<1x8x128xf32, #tpu.memory_space<vmem>>, vector<1x8x128xf32>
    %1 = vector.shape_cast %0 : vector<1x8x128xf32> to vector<8x128xf32>
    %c0_2 = arith.constant 0 : index
    %c0_3 = arith.constant 0 : index
    %2 = vector.load %arg3[%c0_2, %c0_3] : memref<128x256xf32, #tpu.memory_space<vmem>>, vector<128x256xf32>
    %cst = arith.constant dense<0.000000e+00> : vector<8x256xf32>
    %3 = tpu.matmul %1, %2, %cst {dimension_numbers = #tpu.dot_dimension_numbers<[1], [0], [0], [1], [0, 0, 1, 1], [], []>} : vector<8x128xf32>, vector<128x256xf32>, vector<8x256xf32> -> vector<8x256xf32>
    %4 = vector.extract_strided_slice %3 {offsets = [0, 0], sizes = [8, 128], strides = [1, 1]} : vector<8x256xf32> to vector<8x128xf32>
    %5 = vector.shape_cast %4 : vector<8x128xf32> to vector<1x8x128xf32>
    %6 = vector.extract_strided_slice %3 {offsets = [0, 128], sizes = [8, 128], strides = [1, 1]} : vector<8x256xf32> to vector<8x128xf32>
    %7 = vector.shape_cast %6 : vector<8x128xf32> to vector<1x8x128xf32>
    %c0_4 = arith.constant 0 : index
    %c0_5 = arith.constant 0 : index
    %c0_6 = arith.constant 0 : index
    %8 = vector.load %arg2[%c0_4, %c0_5, %c0_6] : memref<1x8x8xf32, #tpu.memory_space<vmem>>, vector<1x8x8xf32>
    %cst_7 = arith.constant dense<0.000000e+00> : vector<1x8xf32>
    %9 = vector.multi_reduction <add>, %8, %cst_7 [2] : vector<1x8x8xf32> to vector<1x8xf32>
    %10 = vector.shape_cast %9 : vector<1x8xf32> to vector<1x8x1xf32>
    %cst_8 = arith.constant 0.000000e+00 : f32
    %11 = vector.broadcast %cst_8 : f32 to vector<1x8x1xf32>
    %12 = arith.cmpf oeq, %10, %11 : vector<1x8x1xf32>
    %cst_9 = arith.constant 1.000000e+00 : f32
    %13 = vector.broadcast %cst_9 : f32 to vector<1x8x1xf32>
    %14 = arith.divf %13, %10 : vector<1x8x1xf32>
    %cst_10 = arith.constant 0.000000e+00 : f32
    %15 = vector.broadcast %cst_10 : f32 to vector<1x8x1xf32>
    %16 = arith.select %12, %15, %14 : vector<1x8x1xi1>, vector<1x8x1xf32>
    "tpu.trace_start"() <{level = 10 : i32, message = "bnm,bme->bne"}> : () -> ()
    %cst_11 = arith.constant dense<0.000000e+00> : vector<1x8x128xf32>
    %17 = tpu.matmul %8, %7, %cst_11 {dimension_numbers = #tpu.dot_dimension_numbers<[2], [1], [1], [2], [0, 0, 0, 1, 1, 2], [0], [0]>} : vector<1x8x8xf32>, vector<1x8x128xf32>, vector<1x8x128xf32> -> vector<1x8x128xf32>
    "tpu.trace_stop"() : () -> ()
    %18 = vector.broadcast %16 : vector<1x8x1xf32> to vector<1x8x128xf32>
    %19 = arith.mulf %18, %17 : vector<1x8x128xf32>
    %20 = arith.addf %5, %19 : vector<1x8x128xf32>
    %cst_12 = arith.constant 0.00999999977 : f32
    %21 = vector.broadcast %cst_12 : f32 to vector<1x8x128xf32>
    %22 = arith.mulf %21, %20 : vector<1x8x128xf32>
    %23 = arith.maximumf %20, %22 : vector<1x8x128xf32>
    %c0_13 = arith.constant 0 : index
    %c0_14 = arith.constant 0 : index
    %c0_15 = arith.constant 0 : index
    %24 = vector.load %arg4[%c0_13, %c0_14, %c0_15] : memref<1x8x128xf32, #tpu.memory_space<vmem>>, vector<1x8x128xf32>
    tpu.vector_store %arg4[%c0_13, %c0_14, %c0_15], %23 {strides = array<i32>} : memref<1x8x128xf32, #tpu.memory_space<vmem>>, vector<1x8x128xf32>,
    return
  }
  func.func @transform_0(%arg0: i32) -> (i32, i32, i32) {
    %c0_i32 = arith.constant 0 : i32
    %c0_i32_0 = arith.constant 0 : i32
    %c0_i32_1 = arith.constant 0 : i32
    return %arg0, %c0_i32, %c0_i32_0 : i32, i32, i32
  }
  func.func @transform_1(%arg0: i32) -> (i32, i32, i32) {
    %c0_i32 = arith.constant 0 : i32
    %c0_i32_0 = arith.constant 0 : i32
    %c0_i32_1 = arith.constant 0 : i32
    return %arg0, %c0_i32, %c0_i32_0 : i32, i32, i32
  }
  func.func @transform_2(%arg0: i32) -> (i32, i32) {
    %c0_i32 = arith.constant 0 : i32
    %c0_i32_0 = arith.constant 0 : i32
    %c0_i32_1 = arith.constant 0 : i32
    return %c0_i32, %c0_i32_0 : i32, i32
  }
  func.func @transform_3(%arg0: i32) -> (i32, i32, i32) {
    %c0_i32 = arith.constant 0 : i32
    %c0_i32_0 = arith.constant 0 : i32
    %c0_i32_1 = arith.constant 0 : i32
    return %arg0, %c0_i32, %c0_i32_0 : i32, i32, i32
  }
}

</mosaic_0001>

<bundles_post_ra>
// kernel: tpu_custom_call.1
= control target key start
LH: loop header
LB: loop body
LE: loop exit
PB: predicated region body
PF: predicated region fallthrough
CT: control target
= control target key end

     0   :  { %8 = vsyncpa [#allocation3], 0  ;;  %s1103_s0 = inlined_call_operand.hbm [shape: f32[2,8,128], index: 0, kind: input, shape index: {}]   ;;  %s1104_s1 = inlined_call_operand.hbm [shape: f32[2,8,8], index: 1, kind: input, shape index: {}]   ;;  %s1105_s2 = inlined_call_operand.hbm [shape: f32[128,256], index: 2, kind: input, shape index: {}]   ;;  %s1106_s3 = inlined_call_operand.hbm [shape: f32[2,8,128], index: 3, kind: output, shape index: {}]  }
   0x1   :  { %10 = vsyncpa [#allocation3 + $0x1], 0 }
   0x2   :  { %11 = vsyncpa [#allocation6], 0 }
   0x3   :  { %13 = vsyncpa [#allocation6 + $0x1], 0 }
   0x4   :  { %14 = vsyncpa [#allocation4], 0 }
   0x5   :  { %16 = vsyncpa [#allocation4 + $0x1], 0  ;;  %s861_s12 = smov 0   ;;  %s863_s13 = smov 0  }
   0x6   :  { %s865_s14 = smov 0   ;;  %s867_s15 = smov 0  }
   0x7 LB: > { %s882_s16 = sadd.s32 4294967295, %s831_s15   ;;  %s544_s17 = sadd.s32 4294967294, %s831_s15   ;;  %s831_s15 = sphi %s867_s15, %s1128_s15   ;;  %s827_s14 = sphi %s865_s14, %s1127_s14   ;;  %s823_s13 = sphi %s863_s13, %s1126_s13   ;;  %s819_s12 = sphi %s861_s12, %s1125_s12  }
   0x8   : > { %p42_p0 = scmp.ne.s32.totalorder %s823_s13, %s819_s12  ;;  %p1107_p1 = scmp.eq.s32.totalorder %s882_s16, 0 }
   0x9   : > { %p119_p3 = scmp.eq.s32.totalorder %s544_s17, 1  ;;  %p545_p5 = scmp.ge.s32.totalorder %s831_s15, 1 }
   0xa   : > { %p891_p4 = por %p1107_p1, %p42_p0  ;;  %p126_p7 = scmp.lt.s32.totalorder %s831_s15, 3 }
   0xb   : > { %p896_p6 = por %p119_p3, %p42_p0  ;;  %s833_s21 = smov [#allocation7]  }
   0xc   : > { %s1111_s18 = scalar_select %p891_p4, 1, 0 }
   0xd   : > { %s1112_s19 = scalar_select %p896_p6, 1, 0 }
   0xe   : > { %p901_p8 = pnand %p545_p5, %p126_p7  ;;  %s138_s22 = sshll.u32 %s833_s21, 4  ;;  %s905_s22 = int_to_ptr.vmem [resolvable:$true] %s138_s22 }
   0xf   : > { %s917_s24 = sadd.s32 1, %s831_s15   ;;  %s29_s25 = sadd.s32 1, %s827_s14 }
  0x10   : > { %s1113_s20 = scalar_select %p901_p8, 1, 0 }
  0x11   : > { %p611_p9 = pneg %p901_p8  ;;  %s26_s26 = ssub.s32 %s831_s15, %s917_s24 }
  0x12   : > { %s669_s29 = scalar_lea.hbm %s1105_s2, 4096 }
  0x13   : > { %p912_p11 = pnand %p611_p9, %p1107_p1  ;;  %p670_p12 = scmp.ne.s32.totalorder %s1105_s2, %s669_s29 }
  0x14   : > { %p676_p5 = scmp.lt.u32.totalorder %s669_s29, %s1105_s2 }
  0x15   : > { %p671_p13 = pneg %p912_p11 }
  0x17   : > { %p672_p0 = pnand %p671_p13, %p670_p12 }
  0x19   : > { %p673_p3 = pneg %p672_p0 }
  0x1b   : > { %p678_p7 = pnand %p676_p5, %p673_p3 }
  0x1d   : > { %681 = shalt.err (!%p678_p7)
}
  0x1e   : > { %s682_s7 = scalar_lea.vmem %s905_s22, 4096  ;;  %p690_p2 = scmp.lt.s32.totalorder %s905_s22, %s905_s22 }
  0x1f   : > { %p683_p9 = scmp.ne.s32.totalorder %s905_s22, %s682_s7  ;;  %p691_p6 = scmp.lt.s32.totalorder %s682_s7, %s682_s7 }
  0x21   : > { %p685_p10 = pnand %p683_p9, %p671_p13  ;;  %p692_p4 = por %p691_p6, %p690_p2 }
  0x23   : > { %p686_p1 = pneg %p685_p10 }
  0x25   : > { %p693_p8 = pnand %p692_p4, %p686_p1 }
  0x27   : > { %696 = shalt.err (!%p693_p8)
}
  0x28   : > { %s834_s8 = smov 256   ;;  %s835_s9 = smov 16  }
  0x29   : > { %614 = dma.hbm_to_vmem [thread:$0]  (!%p912_p11), %s1105_s2, 4096, %s905_s22, [#allocation6], %s834_s8, %s834_s8, %s835_s9  }
  0x2a   : > { %p27_p2 = scmp.eq.s32.totalorder %s26_s26, 0  ;;  %p36_p1 = scmp.ne.s32.totalorder %s827_s14, %s823_s13 }
  0x2b   : > { %p37_p4 = scmp.eq.s32.totalorder %s831_s15, 0  ;;  %p627_p6 = scmp.lt.s32.totalorder %s831_s15, 2 }
  0x2c   : > { %s948_s17 = scalar_select %p27_p2, %s827_s14, %s29_s25  }
  0x2d   : > { %p38_p8 = por %p37_p4, %p36_p1  ;;  %p1115_p10 = scmp.eq.s32.totalorder %s882_s16, 1 }
  0x2e   : > { %s152_s27 = sand.u32 1, %s827_s14   ;;  %s549_s28 = sshll.u32 %s831_s15, 7 }
  0x2f   : > { %p952_p12 = por %p1115_p10, %p36_p1  ;;  %s958_s29 = sshll.u32 %s152_s27, 3 }
  0x30   : > { %s963_s22 = scalar_lea.hbm %s1103_s0, %s549_s28  ;;  %s156_s25 = scalar_lea.vmem [#allocation2], %s958_s29 }
  0x31   : > { %s1116_s21 = scalar_select %p952_p12, 1, 0 }
  0x32   : > { %s163_s26 = sshll.u32 %s156_s25, 4  ;;  %p966_p11 = pnand %p627_p6, %p38_p8  ;;  %s970_s26 = int_to_ptr.vmem [resolvable:$true] %s163_s26 }
  0x33   : > { %s975_s7 = scalar_lea.hbm %s1104_s1, %s549_s28  ;;  %s153_s8 = scalar_lea.sflag [#allocation3], %s152_s27 }
  0x34   : > { %s697_s9 = scalar_lea.hbm %s963_s22, 128  ;;  %p699_p0 = pneg %p966_p11 }
  0x35   : > { %p698_p13 = scmp.ne.s32.totalorder %s963_s22, %s697_s9  ;;  %s702_s23 = scalar_lea.hbm %s1103_s0, 256 }
  0x36   : > { %p703_p7 = scmp.lt.u32.totalorder %s963_s22, %s1103_s0  ;;  %p704_p9 = scmp.lt.u32.totalorder %s702_s23, %s697_s9 }
  0x37   : > { %p700_p3 = pnand %p699_p0, %p698_p13  ;;  %p706_p1 = scmp.lt.u32.totalorder %s697_s9, %s963_s22 }
  0x38   : > { %p705_p2 = por %p704_p9, %p703_p7 }
  0x39   : > { %p701_p5 = pneg %p700_p3 }
  0x3a   : > { %p707_p4 = por %p706_p1, %p705_p2 }
  0x3c   : > { %p708_p6 = pnand %p707_p4, %p701_p5 }
  0x3e   : > { %711 = shalt.err (!%p708_p6)
}
  0x3f   : > { %s712_s27 = scalar_lea.vmem %s970_s26, 128  ;;  %s836_s28 = smov [#allocation2]  }
  0x40   : > { %p713_p8 = scmp.ne.s32.totalorder %s970_s26, %s712_s27  ;;  %s717_s5 = sshll.u32 %s836_s28, 4  ;;  %s718_s5 = int_to_ptr.vmem [resolvable:$false] %s717_s5 }
  0x41   : > { %s719_s6 = scalar_lea.vmem %s718_s5, 256  ;;  %p720_p3 = scmp.lt.s32.totalorder %s970_s26, %s718_s5 }
  0x42   : > { %p715_p10 = pnand %p713_p8, %p699_p0  ;;  %p721_p7 = scmp.lt.s32.totalorder %s719_s6, %s712_s27 }
  0x44   : > { %p716_p13 = pneg %p715_p10  ;;  %p722_p9 = por %p721_p7, %p720_p3 }
  0x46   : > { %p723_p2 = pnand %p722_p9, %p716_p13 }
  0x48   : > { %726 = shalt.err (!%p723_p2)
}
  0x49   : > { %618 = dma.hbm_to_vmem [thread:$0]  (!%p966_p11), %s963_s22, 128, %s970_s26, %s153_s8  }
  0x4a   : > { %s170_s9 = sand.u32 1, %s831_s15   ;;  %s174_s10 = scalar_lea.vmem [#allocation5], %s958_s29 }
  0x4b   : > { %s181_s11 = sshll.u32 %s174_s10, 4  ;;  %s171_s23 = scalar_lea.sflag [#allocation6], %s170_s9  ;;  %s182_s11 = int_to_ptr.vmem [resolvable:$true] %s181_s11 }
  0x4c   : > { %s727_s30 = scalar_lea.hbm %s975_s7, 128  ;;  %s732_s28 = scalar_lea.hbm %s1104_s1, 256 }
  0x4d   : > { %p728_p5 = scmp.ne.s32.totalorder %s975_s7, %s727_s30  ;;  %p733_p6 = scmp.lt.u32.totalorder %s975_s7, %s1104_s1 }
  0x4e   : > { %p734_p8 = scmp.lt.u32.totalorder %s732_s28, %s727_s30  ;;  %p736_p13 = scmp.lt.u32.totalorder %s727_s30, %s975_s7 }
  0x4f   : > { %p730_p1 = pnand %p728_p5, %p699_p0 }
  0x50   : > { %p735_p10 = por %p734_p8, %p733_p6 }
  0x51   : > { %p731_p4 = pneg %p730_p1 }
  0x52   : > { %p737_p3 = por %p736_p13, %p735_p10 }
  0x54   : > { %p738_p7 = pnand %p737_p3, %p731_p4 }
  0x56   : > { %741 = shalt.err (!%p738_p7)
}
  0x57   : > { %s742_s29 = scalar_lea.vmem %s182_s11, 128  ;;  %s837_s22 = smov [#allocation5]  }
  0x58   : > { %p743_p9 = scmp.ne.s32.totalorder %s182_s11, %s742_s29  ;;  %s747_s26 = sshll.u32 %s837_s22, 4  ;;  %s748_s26 = int_to_ptr.vmem [resolvable:$false] %s747_s26 }
  0x59   : > { %s749_s8 = scalar_lea.vmem %s748_s26, 256  ;;  %p750_p1 = scmp.lt.s32.totalorder %s182_s11, %s748_s26 }
  0x5a   : > { %p745_p2 = pnand %p743_p9, %p699_p0  ;;  %p751_p12 = scmp.lt.s32.totalorder %s749_s8, %s742_s29 }
  0x5c   : > { %p746_p5 = pneg %p745_p2  ;;  %p752_p6 = por %p751_p12, %p750_p1 }
  0x5e   : > { %p753_p8 = pnand %p752_p6, %p746_p5 }
  0x60   : > { %756 = shalt.err (!%p753_p8)
}
  0x61   : > { %621 = dma.hbm_to_vmem [thread:$0]  (!%p966_p11), %s975_s7, 128, %s182_s11, %s171_s23  }
  0x62   : > { %p1118_p4 = scmp.ne.s32.totalorder %s1113_s20, 0 }
  0x63   : > { %s1026_s9 = sand.u32 (!%p1118_p4), 1, %s823_s13   ;;  %p1119_p12 = scmp.ne.s32.totalorder (!%p1118_p4), %s1111_s18, 0 }
  0x64   : > { %190 = sbr.rel (%p1118_p4) target bundleno = 597 (0x255), region = 32  ;;  %s1029_s10 = sshll.u32 (!%p1118_p4), %s1026_s9, 3 }
  0x65   : > { %s193_s30 = scalar_lea.sflag (!%p1118_p4), [#allocation3], %s1026_s9  ;;  %s196_s25 = scalar_lea.vmem (!%p1118_p4), [#allocation2], %s1029_s10 }
  0x6b   : > { %802 = dma.done.wait (%p1119_p12), %s193_s30, 128  }
  0x6c   : > { %804 = vsyncadd (%p1119_p12), %s193_s30, 4294967168  ;;  %s201_s20 = sand.u32 1, %s882_s16   ;;  %s205_s7 = scalar_lea.vmem [#allocation5], %s1029_s10 }
  0x6d   : > { %s202_s4 = scalar_lea.sflag [#allocation6], %s201_s20 }
  0x6e   : > { %806 = dma.done.wait (%p1119_p12), %s202_s4, 128  }
  0x6f   : > { %808 = vsyncadd (%p1119_p12), %s202_s4, 4294967168  ;;  %p1120_p11 = scmp.eq.s32.totalorder %s882_s16, 0 }
  0x71   : > { %810 = dma.done.wait (%p1120_p11), [#allocation6], 4096   ;;  %p1121_p0 = pmov %p1120_p11 }
  0x72   : > { %v838_v0 = vmov 0.0   ;;  %v239_v1 = vld [vmem:[#allocation7 + $0x8] sm:$0xff]  ;;  %v241_v2 = vld [vmem:[#allocation7 + $0x18] sm:$0xff]  ;;  %v238_v3 = vld [vmem:[#allocation7] sm:$0xff]  ;;  %vm839_vm0 = vmmov 0   ;;  %vm342_vm1 = vcmask 64512  }
  0x73   : > { %812 = vsyncadd (%p1121_p0), [#allocation6], 4294963200  ;;  %334 = vmatprep.mubr.f32.mxu0 %v838_v0  ;;  %564 = vmatprep.subr.mxu1 %v838_v0  ;;  %v569_v4 = vpack.c.bf16 %v241_v2, %v239_v1  ;;  %v240_v5 = vld [vmem:[#allocation7 + $0x10] sm:$0xff]  ;;  %v243_v6 = vld [vmem:[#allocation7 + $0x28] sm:$0xff]  ;;  %s559_s18 = sshll.u32 %s882_s16, 7  ;;  %s236_s11 = scalar_lea.vmem [#allocation8], %s1029_s10 }
  0x74   : > { %v245_v7 = vld [vmem:[#allocation7 + $0x38] sm:$0xff]  ;;  %v571_v8 = vpack.c.bf16 %v240_v5, %v238_v3  ;;  %v242_v10 = vld [vmem:[#allocation7 + $0x20] sm:$0xff]  ;;  %v244_v11 = vld [vmem:[#allocation7 + $0x30] sm:$0xff]  ;;  %566 = vmatprep.mubr.msk.f32.mxu1 %vm839_vm0, %v838_v0  ;;  %s442_s23 = sshll.u32 %s236_s11, 4  ;;  %s1059_s5 = scalar_lea.hbm %s1106_s3, %s559_s18  ;;  %s1061_s23 = int_to_ptr.vmem [resolvable:$true] %s442_s23 }
  0x75   : > { %v573_v9 = vpack.c.bf16 %v245_v7, %v243_v6  ;;  %v247_v12 = vld [vmem:[#allocation7 + $0x48] sm:$0xff]  ;;  %570 = vmatprep.subr.bf16.mxu0 %v569_v4  ;;  %v249_v13 = vld [vmem:[#allocation7 + $0x58] sm:$0xff]  ;;  %v575_v14 = vpack.c.bf16 %v244_v11, %v242_v10  ;;  %v246_v16 = vld [vmem:[#allocation7 + $0x40] sm:$0xff]  ;;  %s429_s6 = scalar_lea.sflag [#allocation4], %s1026_s9  ;;  %s757_s29 = scalar_lea.vmem %s1061_s23, 128 }
  0x76   : > { %572 = vmatpush1.bf16.msra.mxu0 %v571_v8  ;;  %v577_v15 = vpack.c.bf16 %v249_v13, %v247_v12  ;;  %v248_v17 = vld [vmem:[#allocation7 + $0x50] sm:$0xff]  ;;  %v251_v18 = vld [vmem:[#allocation7 + $0x68] sm:$0xff]  ;;  %v253_v19 = vld [vmem:[#allocation7 + $0x78] sm:$0xff]  ;;  %p758_p10 = scmp.ne.s32.totalorder %s1061_s23, %s757_s29  ;;  %p1122_p13 = scmp.ne.s32.totalorder %s1116_s21, 0 }
  0x77   : > { %574 = vmatprep.subr.bf16.mxu0 %v573_v9  ;;  %v579_v20 = vpack.c.bf16 %v248_v17, %v246_v16  ;;  %v581_v21 = vpack.c.bf16 %v253_v19, %v251_v18  ;;  %v250_v22 = vld [vmem:[#allocation7 + $0x60] sm:$0xff]  ;;  %v252_v23 = vld [vmem:[#allocation7 + $0x70] sm:$0xff]  ;;  %v255_v24 = vld [vmem:[#allocation7 + $0x88] sm:$0xff]  ;;  %s840_s16 = smov [#allocation8]  }
  0x78   : > { %v257_v25 = vld [vmem:[#allocation7 + $0x98] sm:$0xff]  ;;  %v583_v26 = vpack.c.bf16 %v252_v23, %v250_v22  ;;  %v254_v28 = vld [vmem:[#allocation7 + $0x80] sm:$0xff]  ;;  %v256_v29 = vld [vmem:[#allocation7 + $0x90] sm:$0xff]  ;;  %p759_p3 = pnand %p758_p10, %p1122_p13  ;;  %s761_s22 = sshll.u32 %s840_s16, 4  ;;  %s762_s22 = int_to_ptr.vmem [resolvable:$false] %s761_s22 }
  0x79   : > { %v585_v27 = vpack.c.bf16 %v257_v25, %v255_v24  ;;  %v259_v30 = vld [vmem:[#allocation7 + $0xa8] sm:$0xff]  ;;  %v261_v31 = vld [vmem:[#allocation7 + $0xb8] sm:$0xff]  ;;  %v587_v32 = vpack.c.bf16 %v256_v29, %v254_v28  ;;  %v258_v34 = vld [vmem:[#allocation7 + $0xa0] sm:$0xff]  ;;  %s763_s26 = scalar_lea.vmem %s762_s22, 256  ;;  %p764_p9 = scmp.lt.s32.totalorder %s1061_s23, %s762_s22 }
  0x7a   : > { %576 = vmatpush1.bf16.msra.mxu0 %v575_v14  ;;  %v589_v33 = vpack.c.bf16 %v261_v31, %v259_v30  ;;  %v260_v35 = vld [vmem:[#allocation7 + $0xb0] sm:$0xff]  ;;  %v263_v36 = vld [vmem:[#allocation7 + $0xc8] sm:$0xff]  ;;  %v265_v37 = vld [vmem:[#allocation7 + $0xd8] sm:$0xff]  ;;  %p760_p7 = pneg %p759_p3  ;;  %p765_p2 = scmp.lt.s32.totalorder %s763_s26, %s757_s29 }
  0x7b   : > { %578 = vmatprep.subr.bf16.mxu0 %v577_v15  ;;  %v591_v38 = vpack.c.bf16 %v260_v35, %v258_v34  ;;  %v593_v39 = vpack.c.bf16 %v265_v37, %v263_v36  ;;  %v262_v40 = vld [vmem:[#allocation7 + $0xc0] sm:$0xff]  ;;  %v264_v41 = vld [vmem:[#allocation7 + $0xd0] sm:$0xff]  ;;  %v267_v42 = vld [vmem:[#allocation7 + $0xe8] sm:$0xff] }
  0x7c   : > { %v269_v43 = vld [vmem:[#allocation7 + $0xf8] sm:$0xff]  ;;  %v595_v44 = vpack.c.bf16 %v264_v41, %v262_v40  ;;  %v266_v46 = vld [vmem:[#allocation7 + $0xe0] sm:$0xff]  ;;  %v268_v47 = vld [vmem:[#allocation7 + $0xf0] sm:$0xff]  ;;  %p766_p5 = por %p765_p2, %p764_p9 }
  0x7d   : > { %v597_v45 = vpack.c.bf16 %v269_v43, %v267_v42  ;;  %v599_v48 = vpack.c.bf16 %v268_v47, %v266_v46  ;;  %v237_v49 = vld [vmem:[%s196_s25] sm:$0xff]  ;;  %v341_v50 = vld [vmem:[%s205_s7] sm:$0xff] }
  0x7e   : > { %580 = vmatpush1.bf16.msra.mxu0 %v579_v20  ;;  %v343_v51 = vsel %vm342_vm1, %v341_v50, 0.0  ;;  %p767_p1 = pnand %p766_p5, %p760_p7 }
  0x7f   : > { %582 = vmatprep.subr.bf16.mxu0 %v581_v21  ;;  %344 = vadd.xlane.f32.xlu0 %v343_v51 }
  0x82   : > { %584 = vmatpush1.bf16.msra.mxu0 %v583_v26 }
  0x83   : > { %586 = vmatprep.subr.bf16.mxu0 %v585_v27 }
  0x86   : > { %588 = vmatpush1.bf16.msra.mxu0 %v587_v32 }
  0x87   : > { %590 = vmatprep.subr.bf16.mxu0 %v589_v33 }
  0x8a   : > { %592 = vmatpush1.bf16.msra.mxu0 %v591_v38 }
  0x8b   : > { %594 = vmatprep.subr.bf16.mxu0 %v593_v39 }
  0x8e   : > { %596 = vmatpush1.bf16.msra.mxu0 %v595_v44 }
  0x8f   : > { %598 = vmatprep.subr.bf16.mxu0 %v597_v45 }
  0x92   : > { %600 = vmatpush1.bf16.msra.mxu0 %v599_v48 }
  0x95   : > { %335 = vmatmul.mubr.f32.vlgmr.msra.gmra.mrb[0].mxu0 %v237_v49 }
 0x10c   : > { %v345_v54 = vpop.xlane.xlu0 %344 }
 0x10d   : > { %667 = vrcp.f32 %v345_v54  ;;  %vm346_vm2 = vcmp.eq.f32.partialorder %v345_v54, 0.0 }
 0x117   : > { %v668_v55 = vpop.eup %667 }
 0x118   : > { %v349_v56 = vsel %vm346_vm2, 0.0, %v668_v55 }
 0x168   : > { %v336_v52 = vpop.f32.mrb[0].mxu0 }
 0x169   : > { %v338_v53 = vpop.f32.mrb[1].mxu0 }
 0x16a   : > { %565 = vmatpush3.msra.mxu1 %v338_v53 }
 0x16b   : > { %567 = vmatmul.mubr.msk.f32.vlgmr.msra.gmra.mrb[0].mxu1 %vm342_vm1, %v341_v50 }
 0x23e   : > { %v419_v57 = vpop.f32.mrb[0].mxu1 }
 0x23f   : > { %v423_v58 = vmul.f32 %v419_v57, %v349_v56  ;;  %v568_v59 = vpop.f32.mrb[1].mxu1 }
 0x241   : > { %v424_v60 = vadd.f32 %v423_v58, %v336_v52 }
 0x243   : > { %v425_v61 = vmul.f32 0.01, %v424_v60 }
 0x245   : > { %v426_v62 = vmax.f32 %v424_v60, %v425_v61 }
 0x247   : > { %427 = vst [vmem:[%s236_s11] sm:$0xff] %v426_v62 }
 0x248   : > { %770 = shalt.err (!%p767_p1)
}
 0x249   : > { %s771_s8 = scalar_lea.hbm %s1059_s5, 128  ;;  %s775_s30 = scalar_lea.hbm %s1106_s3, 256 }
 0x24a   : > { %p772_p6 = scmp.ne.s32.totalorder %s1059_s5, %s771_s8  ;;  %p776_p12 = scmp.lt.u32.totalorder %s1059_s5, %s1106_s3 }
 0x24b   : > { %p777_p11 = scmp.lt.u32.totalorder %s775_s30, %s771_s8  ;;  %p779_p10 = scmp.lt.u32.totalorder %s771_s8, %s1059_s5 }
 0x24c   : > { %p773_p8 = pnand %p772_p6, %p1122_p13 }
 0x24d   : > { %p778_p0 = por %p777_p11, %p776_p12 }
 0x24e   : > { %p774_p4 = pneg %p773_p8 }
 0x24f   : > { %p780_p3 = por %p779_p10, %p778_p0 }
 0x251   : > { %p781_p7 = pnand %p780_p3, %p774_p4 }
 0x253   : > { %784 = shalt.err (!%p781_p7)
}
 0x254   : > { %609 = dma.vmem_to_hbm [thread:$0]  (%p1122_p13), %s1061_s23, 128, %s1059_s5, %s429_s6  }
 0x255 PF: > { %s454_s4 = sand.u32 1, %s819_s12   ;;  %p1123_p9 = scmp.ne.s32.totalorder %s1112_s19, 0 }
 0x256   : > { %p1124_p2 = scmp.ge.s32.totalorder %s831_s15, 2  ;;  %s455_s7 = scalar_lea.sflag [#allocation4], %s454_s4 }
 0x258   : > { %p623_p5 = pnand %p1124_p2, %p1123_p9 }
 0x25a   : > { %814 = dma.done.wait (!%p623_p5), %s455_s7, 128  }
 0x25b   : > { %816 = vsyncadd (!%p623_p5), %s455_s7, 4294967168  ;;  %p19_p1 = scmp.ge.s32.totalorder %s917_s24, 4   ;;  %s1125_s12 = smov %s823_s13 }
 0x25c   : > { %s1126_s13 = smov %s827_s14  ;;  %s1127_s14 = smov %s948_s17 }
 0x25d   : > { %s1128_s15 = smov %s917_s24  ;;  %21 = sbr.rel (!%p19_p1) target bundleno = 7 (0x7), region = 94 }
 0x264   :  { %460 = vsyncpa [#allocation3], 1 }
 0x265   :  { %462 = vsyncpa [#allocation3 + $0x1], 1 }
 0x266   :  { %463 = vsyncpa [#allocation6], 1 }
 0x267   :  { %465 = vsyncpa [#allocation6 + $0x1], 1 }
 0x268   :  { %466 = vsyncpa [#allocation4], 1 }
 0x269   :  { %468 = vsyncpa [#allocation4 + $0x1], 1 }

</bundles_post_ra>
